<compile_context>
chip_gen: v7x
topology: tpu7x:2x2x1
jax: 0.10.0
libtpu: 0.0.40
codegen_flags: <defaults>
</compile_context>

<pallas_src>
import math

import jax
import jax.numpy as jnp
from jax import lax
from jax.experimental import pallas as pl
from jax.experimental.pallas import tpu as pltpu


def _round_up(x, m):
    return ((x + m - 1) // m) * m


def _make_kernel(*, tb, tg, Cin, Cout, W, HW, KH, KW):
    """Builds the grid-step kernel (closes over static shape parameters)."""
    tgc = tg * Cin          # patch rows contributed per tap per chunk
    tgo = tg * Cout         # output rows produced per chunk
    offs = [ky * W + kx for ky in range(KH) for kx in range(KW)]
    n_chunks = tb // tg     # static trip count

    def kernel(x_ref, l_ref, o_ref, p_ref):
        # x_ref : (tb*Cin, HWp)              bf16, natural (t, ci) row order
        # l_ref : (tg*Cout, KH*KW*tg*Cin)    bf16, block-diagonal weight slab
        # o_ref : (tb*Cout, HW)              f32 output rows (t, co) order
        # p_ref : VMEM scratch (KH*KW*tg*Cin, HW) bf16 — in-VMEM im2col slab
        L = l_ref[...]                       # resident / loop-invariant

        def chunk_body(c, carry):
            r0 = pl.multiple_of(c * tgc, tgc)
            xs = x_ref[pl.ds(r0, tgc), :]    # (tg*Cin, HWp), one load per chunk
            # In-VMEM im2col: each tap is a static lane-shifted slice of xs
            # (the lane dim was padded in the wrapper so every slice is in
            # bounds; invalid spatial positions are discarded by the wrapper).
            for j, off in enumerate(offs):
                p_ref[j * tgc:(j + 1) * tgc, :] = xs[:, off:off + HW]
            # One GEMM per chunk of tg time-steps, f32 accumulation on the MXU.
            acc = jnp.dot(L, p_ref[...], preferred_element_type=jnp.float32)
            o0 = pl.multiple_of(c * tgo, tgo)
            o_ref[pl.ds(o0, tgo), :] = acc.astype(o_ref.dtype)
            return carry

        lax.fori_loop(0, n_chunks, chunk_body, 0)

    return kernel


def convolution_forward(x_nchw, weight_oihw, *, compute_dtype=jnp.bfloat16,
                        vmem_budget_bytes=12 * 1024 * 1024):
    """Equivalent of Convolution.forward: fn.conv2d(x, w, stride=1, padding=0)."""
    T, Cin, H, W = x_nchw.shape
    Cout, Cin_w, KH, KW = weight_oihw.shape
    assert Cin == Cin_w
    Ho, Wo = H - KH + 1, W - KW + 1
    HW = H * W
    # Pad the flattened spatial (lane) dim so every tap offset is a static,
    # in-bounds slice; round to a multiple of 128 for lane-dense loads.
    HWp = _round_up(HW + (KH - 1) * W + (KW - 1), 128)

    # ---- chunk size tg: time-steps sharing one GEMM ----------------------
    # Chosen so both the (tg*Cin)-row input slices and the (tg*Cout)-row
    # output stores stay 8-sublane aligned.
    tg_min = math.lcm(8 // math.gcd(Cin, 8), 8 // math.gcd(Cout, 8))
    tg = tg_min * max(1, -(-4 // tg_min))          # ~4 time-steps per GEMM

    # ---- block size tb: time-steps per grid step, from a VMEM budget -----
    in_item = jnp.dtype(compute_dtype).itemsize
    out_item = jnp.dtype(x_nchw.dtype).itemsize
    per_t = 2 * (Cin * HWp * in_item + Cout * HW * out_item)   # double-buffered
    tb = max(tg, (vmem_budget_bytes // per_t) // tg * tg)
    # keep >= 2 grid steps when T allows it (v7x has 2 TensorCores)
    tb = min(tb, max(tg, _round_up(-(-T // 2), tg)))
    tb = min(tb, _round_up(T, tg))
    Tpad = _round_up(T, tb)                        # cheap zero-padded tail
    grid = (Tpad // tb,)

    # ---- wrapper-side layout plumbing (no 9x im2col in HBM) --------------
    x2 = x_nchw.reshape(T * Cin, HW).astype(compute_dtype)
    x2 = jnp.pad(x2, ((0, (Tpad - T) * Cin), (0, HWp - HW)))   # (Tpad*Cin, HWp)

    # Block-diagonal weight slab:
    #   L[(t,co), (j,u,ci)] = delta(t,u) * w[co, ci, ky_j, kx_j]
    # (tg-fold redundant zeros, but the GEMM cost here is push/byte bound,
    #  not FLOP bound, and this lets tg time-steps share one dot.)
    w_taps = jnp.transpose(weight_oihw, (2, 3, 1, 0)).reshape(KH * KW, Cin, Cout)
    eye = jnp.eye(tg, dtype=weight_oihw.dtype)
    Kc = KH * KW * tg * Cin
    L = jnp.einsum('tu,jco->tojuc', eye, w_taps).reshape(tg * Cout, Kc)
    L = L.astype(compute_dtype)

    kernel = _make_kernel(tb=tb, tg=tg, Cin=Cin, Cout=Cout, W=W, HW=HW,
                          KH=KH, KW=KW)

    out_dtype = x_nchw.dtype
    cost = pl.CostEstimate(
        flops=int(2 * (Tpad // tg) * (tg * Cout) * Kc * HW),
        transcendentals=0,
        bytes_accessed=int(x2.size * x2.dtype.itemsize
                           + L.size * L.dtype.itemsize
                           + Tpad * Cout * HW * jnp.dtype(out_dtype).itemsize),
    )

    out_rows = pl.pallas_call(
        kernel,
        out_shape=jax.ShapeDtypeStruct((Tpad * Cout, HW), out_dtype),
        grid_spec=pltpu.PrefetchScalarGridSpec(
            num_scalar_prefetch=0,
            grid=grid,
            in_specs=[
                # tb time-steps of raw input per grid step (no HBM im2col)
                pl.BlockSpec((tb * Cin, HWp), lambda i: (i, 0)),
                # small weight slab, constant index -> stays resident in VMEM
                pl.BlockSpec((tg * Cout, Kc), lambda i: (0, 0)),
            ],
            # lane-dense (HW is 256 here, a multiple of 128) output rows
            out_specs=pl.BlockSpec((tb * Cout, HW), lambda i: (i, 0)),
            scratch_shapes=[pltpu.VMEM((Kc, HW), compute_dtype)],
        ),
        compiler_params=pltpu.CompilerParams(
            dimension_semantics=("parallel",),       # shard time blocks on v7x
            vmem_limit_bytes=32 * 1024 * 1024,       # explicit (v5e default=16MiB)
        ),
        cost_estimate=cost,
    )(x2, L)

    # Free reshape + valid-region slice: (Tpad*Cout, H*W) -> (T, Cout, Ho, Wo)
    out = out_rows[:T * Cout].reshape(T, Cout, H, W)[:, :, :Ho, :Wo]
    return out


def init_convolution_weight(key, in_channels, out_channels, kernel_size,
                            weight_mean=0.8, weight_std=0.02):
    """Deterministic stand-in for Convolution.reset_weight (normal init)."""
    kh, kw = kernel_size
    return weight_mean + weight_std * jax.random.normal(
        key, (out_channels, in_channels, kh, kw), dtype=jnp.float32)


if __name__ == "__main__":
    key = jax.random.PRNGKey(0)
    k_x, k_w = jax.random.split(key)

    # Small shapes consistent with the module: (T, C_in, H, W)
    T, C_in, H, W = 2, 4, 16, 16
    C_out, K = 8, 3

    # Spike-wave-like binary input (exactly representable in bf16).
    x = (jax.random.uniform(k_x, (T, C_in, H, W)) < 0.3).astype(jnp.float32)
    weight = init_convolution_weight(k_w, C_in, C_out, (K, K))

    out = jax.jit(convolution_forward)(x, weight)
    out = jax.block_until_ready(out)
    assert out.shape == (T, C_out, H - K + 1, W - K + 1)

    # Cross-check against XLA's conv on the *same* bf16-rounded operands
    # (both sides accumulate in f32, so the comparison is tight).
    # TODO(synk): pass compute_dtype=jnp.float32 if exact f32 parity with the
    # PyTorch module's f32 weights is required.
    x_bf = x.astype(jnp.bfloat16).astype(jnp.float32)
    w_bf = weight.astype(jnp.bfloat16).astype(jnp.float32)
    ref = lax.conv_general_dilated(
        x_bf, w_bf, window_strides=(1, 1), padding="VALID",
        dimension_numbers=("NCHW", "OIHW", "NCHW"))
    assert jnp.allclose(out, ref, atol=1e-3, rtol=1e-3), "mismatch vs reference conv"

    print("KERNEL_OK")
</pallas_src>

<mosaic_0001>
module attributes {stable_mosaic.version = 11 : i64} {
  func.func @kernel(%arg0: i32, %arg1: memref<16x384xbf16, #tpu.memory_space<vmem>>, %arg2: memref<32x144xbf16, #tpu.memory_space<vmem>>, %arg3: memref<32x256xf32, #tpu.memory_space<vmem>>, %arg4: memref<144x256xbf16, #tpu.memory_space<vmem>>) attributes {dimension_semantics = [#tpu.dimension_semantics<parallel>], iteration_bounds = array<i64: 1>, scalar_prefetch = 0 : i64, scratch_operands = 1 : i64, tpu.core_type = #tpu.core_type<tc>, window_params = [{transform_indices = @transform_0, window_bounds = array<i64: 16, 384>}, {pipeline_mode = #tpu.pipeline_mode<synchronous>, transform_indices = @transform_1, window_bounds = array<i64: 32, 144>}, {transform_indices = @transform_2, window_bounds = array<i64: 32, 256>}]} {
    %c0 = arith.constant 0 : index
    %c0_0 = arith.constant 0 : index
    %0 = vector.load %arg2[%c0, %c0_0] : memref<32x144xbf16, #tpu.memory_space<vmem>>, vector<32x144xbf16>
    %c0_i32 = arith.constant 0 : i32
    %c16_i32 = arith.constant 16 : i32
    %1 = arith.muli %c0_i32, %c16_i32 : i32
    %2 = tpu.assume_multiple %1, 16 : i32
    %3 = arith.index_cast %2 : i32 to index
    %c0_1 = arith.constant 0 : index
    %4 = vector.load %arg1[%3, %c0_1] : memref<16x384xbf16, #tpu.memory_space<vmem>>, vector<16x384xbf16>
    %5 = vector.extract_strided_slice %4 {offsets = [0, 0], sizes = [16, 256], strides = [1, 1]} : vector<16x384xbf16> to vector<16x256xbf16>
    %c0_2 = arith.constant 0 : index
    %c0_3 = arith.constant 0 : index
    %6 = vector.load %arg4[%c0_2, %c0_3] : memref<144x256xbf16, #tpu.memory_space<vmem>>, vector<16x256xbf16>
    tpu.vector_store %arg4[%c0_2, %c0_3], %5 {strides = array<i32>} : memref<144x256xbf16, #tpu.memory_space<vmem>>, vector<16x256xbf16>,
    %7 = vector.extract_strided_slice %4 {offsets = [0, 1], sizes = [16, 256], strides = [1, 1]} : vector<16x384xbf16> to vector<16x256xbf16>
    %c16 = arith.constant 16 : index
    %c0_4 = arith.constant 0 : index
    %8 = vector.load %arg4[%c16, %c0_4] : memref<144x256xbf16, #tpu.memory_space<vmem>>, vector<16x256xbf16>
    tpu.vector_store %arg4[%c16, %c0_4], %7 {strides = array<i32>} : memref<144x256xbf16, #tpu.memory_space<vmem>>, vector<16x256xbf16>,
    %9 = vector.extract_strided_slice %4 {offsets = [0, 2], sizes = [16, 256], strides = [1, 1]} : vector<16x384xbf16> to vector<16x256xbf16>
    %c32 = arith.constant 32 : index
    %c0_5 = arith.constant 0 : index
    %10 = vector.load %arg4[%c32, %c0_5] : memref<144x256xbf16, #tpu.memory_space<vmem>>, vector<16x256xbf16>
    tpu.vector_store %arg4[%c32, %c0_5], %9 {strides = array<i32>} : memref<144x256xbf16, #tpu.memory_space<vmem>>, vector<16x256xbf16>,
    %11 = vector.extract_strided_slice %4 {offsets = [0, 16], sizes = [16, 256], strides = [1, 1]} : vector<16x384xbf16> to vector<16x256xbf16>
    %c48 = arith.constant 48 : index
    %c0_6 = arith.constant 0 : index
    %12 = vector.load %arg4[%c48, %c0_6] : memref<144x256xbf16, #tpu.memory_space<vmem>>, vector<16x256xbf16>
    tpu.vector_store %arg4[%c48, %c0_6], %11 {strides = array<i32>} : memref<144x256xbf16, #tpu.memory_space<vmem>>, vector<16x256xbf16>,
    %13 = vector.extract_strided_slice %4 {offsets = [0, 17], sizes = [16, 256], strides = [1, 1]} : vector<16x384xbf16> to vector<16x256xbf16>
    %c64 = arith.constant 64 : index
    %c0_7 = arith.constant 0 : index
    %14 = vector.load %arg4[%c64, %c0_7] : memref<144x256xbf16, #tpu.memory_space<vmem>>, vector<16x256xbf16>
    tpu.vector_store %arg4[%c64, %c0_7], %13 {strides = array<i32>} : memref<144x256xbf16, #tpu.memory_space<vmem>>, vector<16x256xbf16>,
    %15 = vector.extract_strided_slice %4 {offsets = [0, 18], sizes = [16, 256], strides = [1, 1]} : vector<16x384xbf16> to vector<16x256xbf16>
    %c80 = arith.constant 80 : index
    %c0_8 = arith.constant 0 : index
    %16 = vector.load %arg4[%c80, %c0_8] : memref<144x256xbf16, #tpu.memory_space<vmem>>, vector<16x256xbf16>
    tpu.vector_store %arg4[%c80, %c0_8], %15 {strides = array<i32>} : memref<144x256xbf16, #tpu.memory_space<vmem>>, vector<16x256xbf16>,
    %17 = vector.extract_strided_slice %4 {offsets = [0, 32], sizes = [16, 256], strides = [1, 1]} : vector<16x384xbf16> to vector<16x256xbf16>
    %c96 = arith.constant 96 : index
    %c0_9 = arith.constant 0 : index
    %18 = vector.load %arg4[%c96, %c0_9] : memref<144x256xbf16, #tpu.memory_space<vmem>>, vector<16x256xbf16>
    tpu.vector_store %arg4[%c96, %c0_9], %17 {strides = array<i32>} : memref<144x256xbf16, #tpu.memory_space<vmem>>, vector<16x256xbf16>,
    %19 = vector.extract_strided_slice %4 {offsets = [0, 33], sizes = [16, 256], strides = [1, 1]} : vector<16x384xbf16> to vector<16x256xbf16>
    %c112 = arith.constant 112 : index
    %c0_10 = arith.constant 0 : index
    %20 = vector.load %arg4[%c112, %c0_10] : memref<144x256xbf16, #tpu.memory_space<vmem>>, vector<16x256xbf16>
    tpu.vector_store %arg4[%c112, %c0_10], %19 {strides = array<i32>} : memref<144x256xbf16, #tpu.memory_space<vmem>>, vector<16x256xbf16>,
    %21 = vector.extract_strided_slice %4 {offsets = [0, 34], sizes = [16, 256], strides = [1, 1]} : vector<16x384xbf16> to vector<16x256xbf16>
    %c128 = arith.constant 128 : index
    %c0_11 = arith.constant 0 : index
    %22 = vector.load %arg4[%c128, %c0_11] : memref<144x256xbf16, #tpu.memory_space<vmem>>, vector<16x256xbf16>
    tpu.vector_store %arg4[%c128, %c0_11], %21 {strides = array<i32>} : memref<144x256xbf16, #tpu.memory_space<vmem>>, vector<16x256xbf16>,
    %c0_12 = arith.constant 0 : index
    %c0_13 = arith.constant 0 : index
    %23 = vector.load %arg4[%c0_12, %c0_13] : memref<144x256xbf16, #tpu.memory_space<vmem>>, vector<144x256xbf16>
    %cst = arith.constant dense<0.000000e+00> : vector<32x256xf32>
    %24 = tpu.matmul %0, %23, %cst {dimension_numbers = #tpu.dot_dimension_numbers<[1], [0], [0], [1], [0, 0, 1, 1], [], []>} : vector<32x144xbf16>, vector<144x256xbf16>, vector<32x256xf32> -> vector<32x256xf32>
    %c32_i32 = arith.constant 32 : i32
    %25 = arith.muli %c0_i32, %c32_i32 : i32
    %26 = tpu.assume_multiple %25, 32 : i32
    %27 = arith.index_cast %26 : i32 to index
    %c0_14 = arith.constant 0 : index
    %28 = vector.load %arg3[%27, %c0_14] : memref<32x256xf32, #tpu.memory_space<vmem>>, vector<32x256xf32>
    tpu.vector_store %arg3[%27, %c0_14], %24 {strides = array<i32>} : memref<32x256xf32, #tpu.memory_space<vmem>>, vector<32x256xf32>,
    %c1_i32 = arith.constant 1 : i32
    return
  }
  func.func @transform_0(%arg0: i32) -> (i32, i32) {
    %c0_i32 = arith.constant 0 : i32
    %c0_i32_0 = arith.constant 0 : i32
    return %arg0, %c0_i32 : i32, i32
  }
  func.func @transform_1(%arg0: i32) -> (i32, i32) {
    %c0_i32 = arith.constant 0 : i32
    %c0_i32_0 = arith.constant 0 : i32
    %c0_i32_1 = arith.constant 0 : i32
    return %c0_i32, %c0_i32_0 : i32, i32
  }
  func.func @transform_2(%arg0: i32) -> (i32, i32) {
    %c0_i32 = arith.constant 0 : i32
    %c0_i32_0 = arith.constant 0 : i32
    return %arg0, %c0_i32 : i32, i32
  }
}

</mosaic_0001>

<bundles_post_ra>
// kernel: convolution_forward.1
= control target key start
LH: loop header
LB: loop body
LE: loop exit
PB: predicated region body
PF: predicated region fallthrough
CT: control target
= control target key end

     0   :  { %s300_s13 = smov 127   ;;  %s301_s16 = smov 126   ;;  %vm180_vm0 = vcmask 130048   ;;  %vm46_vm1 = vcmask 1039360   ;;  %vm59_vm2 = vcmask 1031168   ;;  %vm72_vm3 = vcmask 916480   ;;  %s368_s0 = inlined_call_operand.vmem [shape: bf16[16,384], index: 0, kind: input, shape index: {}]   ;;  %s369_s1 = inlined_call_operand.vmem [shape: bf16[32,144], index: 1, kind: input, shape index: {}]   ;;  %s370_s2 = inlined_call_operand.vmem [shape: f32[32,256], index: 2, kind: output, shape index: {}]  }
   0x1   :  { %v290_v0 = vld [vmem:[%s368_s0 + $0x4] ss:$12 sps:$4 sm:$0xff]   ;;  %v292_v1 = vld [vmem:[%s368_s0] ss:$12 sps:$4 sm:$0xff]   ;;  %v293_v2 = vld [vmem:[%s368_s0 + $0x8] ss:$12 sps:$4 sm:$0xff]  }
   0x2   :  { %42 = vrot.lane.b32.xlu0 %v290_v0, %s300_s13  ;;  %187 = vmatprep.subr.bf16.mxu0 %v290_v0  ;;  %s302_s17 = smov 112   ;;  %s303_s18 = smov 111   ;;  %v296_v3 = vld [vmem:[%s369_s1 + $0x4] ss:$8 sps:$4 sm:$0xff]   ;;  %v299_v4 = vld [vmem:[%s369_s1 + $0x14] ss:$8 sps:$4 sm:$0xff]  }
   0x3   :  { %40 = vrot.lane.b32.xlu1 %v292_v1, %s300_s13  ;;  %264 = vmatprep.subr.bf16.mxu1 %v290_v0  ;;  %s304_s19 = smov 110   ;;  %s305_s0 = smov 96   ;;  %vm85_vm4 = vcmask 908288   ;;  %vm98_vm5 = vcmask 900096   ;;  %vm111_vm6 = vcmask 785408   ;;  %vm124_vm7 = vcmask 777216  }
   0x4   :  { %188 = vmatpush1.bf16.msra.mxu0 %v292_v1  ;;  %273 = vmatpush1.bf16.msra.mxu1 %v292_v1  ;;  %s306_s22 = smov 95   ;;  %s307_s25 = smov 94   ;;  %vm137_vm8 = vcmask 769024   ;;  %v294_v45 = vld [vmem:[%s369_s1] ss:$8 sps:$4 sm:$0xff]  }
   0x5   :  { %262 = vmatprep.mubr.msk.bf16.mxu0 %vm180_vm0, %v296_v3  ;;  %263 = vmatprep.mubr.msk.bf16.mxu1 %vm180_vm0, %v299_v4  ;;  %v297_v46 = vld [vmem:[%s369_s1 + $0x10] ss:$8 sps:$4 sm:$0xff]  }
   0x6   :  { %44 = vrot.lane.b32.xlu0 %v293_v2, %s300_s13 }
   0x7   :  { %55 = vrot.lane.b32.xlu1 %v290_v0, %s301_s16 }
   0xa   :  { %57 = vrot.lane.b32.xlu0 %v293_v2, %s301_s16 }
   0xb   :  { %53 = vrot.lane.b32.xlu1 %v292_v1, %s301_s16 }
   0xe   :  { %68 = vrot.lane.b32.xlu0 %v290_v0, %s302_s17 }
   0xf   :  { %70 = vrot.lane.b32.xlu1 %v293_v2, %s302_s17 }
  0x12   :  { %66 = vrot.lane.b32.xlu0 %v292_v1, %s302_s17 }
  0x13   :  { %81 = vrot.lane.b32.xlu1 %v290_v0, %s303_s18 }
  0x16   :  { %83 = vrot.lane.b32.xlu0 %v293_v2, %s303_s18 }
  0x17   :  { %79 = vrot.lane.b32.xlu1 %v292_v1, %s303_s18 }
  0x1a   :  { %94 = vrot.lane.b32.xlu0 %v290_v0, %s304_s19 }
  0x1b   :  { %96 = vrot.lane.b32.xlu1 %v293_v2, %s304_s19 }
  0x1e   :  { %92 = vrot.lane.b32.xlu0 %v292_v1, %s304_s19 }
  0x1f   :  { %107 = vrot.lane.b32.xlu1 %v290_v0, %s305_s0 }
  0x22   :  { %109 = vrot.lane.b32.xlu0 %v293_v2, %s305_s0 }
  0x23   :  { %105 = vrot.lane.b32.xlu1 %v292_v1, %s305_s0 }
  0x26   :  { %120 = vrot.lane.b32.xlu0 %v290_v0, %s306_s22 }
  0x27   :  { %122 = vrot.lane.b32.xlu1 %v293_v2, %s306_s22 }
  0x2a   :  { %118 = vrot.lane.b32.xlu0 %v292_v1, %s306_s22 }
  0x2b   :  { %133 = vrot.lane.b32.xlu1 %v290_v0, %s307_s25 }
  0x2e   :  { %135 = vrot.lane.b32.xlu0 %v293_v2, %s307_s25 }
  0x2f   :  { %131 = vrot.lane.b32.xlu1 %v292_v1, %s307_s25 }
  0x74   :  { %v43_v5 = vpop.permute.xlu0 %42 }
  0x75   :  { %v41_v6 = vpop.permute.xlu1 %40 }
  0x76   :  { %v47_v10 = vsel %vm46_vm1, %v41_v6, %v43_v5 }
  0x78   :  { %v45_v7 = vpop.permute.xlu0 %44 }
  0x79   :  { %v56_v8 = vpop.permute.xlu1 %55  ;;  %v48_v9 = vsel %vm46_vm1, %v43_v5, %v45_v7 }
  0x7a   :  { %189 = vmatprep.subr.bf16.mxu0 %v48_v9  ;;  %265 = vmatprep.subr.bf16.mxu1 %v48_v9 }
  0x7b   :  { %190 = vmatpush1.bf16.msra.mxu0 %v47_v10  ;;  %274 = vmatpush1.bf16.msra.mxu1 %v47_v10 }
  0x7c   :  { %v58_v11 = vpop.permute.xlu0 %57 }
  0x7d   :  { %v54_v12 = vpop.permute.xlu1 %53  ;;  %v61_v13 = vsel %vm59_vm2, %v56_v8, %v58_v11 }
  0x7e   :  { %191 = vmatprep.subr.bf16.mxu0 %v61_v13  ;;  %266 = vmatprep.subr.bf16.mxu1 %v61_v13  ;;  %v60_v14 = vsel %vm59_vm2, %v54_v12, %v56_v8 }
  0x7f   :  { %192 = vmatpush1.bf16.msra.mxu0 %v60_v14  ;;  %275 = vmatpush1.bf16.msra.mxu1 %v60_v14 }
  0x80   :  { %v69_v15 = vpop.permute.xlu0 %68 }
  0x81   :  { %v71_v16 = vpop.permute.xlu1 %70 }
  0x82   :  { %v74_v17 = vsel %vm72_vm3, %v69_v15, %v71_v16 }
  0x83   :  { %193 = vmatprep.subr.bf16.mxu0 %v74_v17  ;;  %267 = vmatprep.subr.bf16.mxu1 %v74_v17 }
  0x84   :  { %v67_v18 = vpop.permute.xlu0 %66 }
  0x85   :  { %v82_v19 = vpop.permute.xlu1 %81  ;;  %v73_v20 = vsel %vm72_vm3, %v67_v18, %v69_v15 }
  0x86   :  { %194 = vmatpush1.bf16.msra.mxu0 %v73_v20  ;;  %276 = vmatpush1.bf16.msra.mxu1 %v73_v20 }
  0x88   :  { %v84_v21 = vpop.permute.xlu0 %83 }
  0x89   :  { %v80_v22 = vpop.permute.xlu1 %79  ;;  %v87_v23 = vsel %vm85_vm4, %v82_v19, %v84_v21 }
  0x8a   :  { %195 = vmatprep.subr.bf16.mxu0 %v87_v23  ;;  %268 = vmatprep.subr.bf16.mxu1 %v87_v23  ;;  %v86_v24 = vsel %vm85_vm4, %v80_v22, %v82_v19 }
  0x8b   :  { %196 = vmatpush1.bf16.msra.mxu0 %v86_v24  ;;  %277 = vmatpush1.bf16.msra.mxu1 %v86_v24 }
  0x8c   :  { %v95_v25 = vpop.permute.xlu0 %94 }
  0x8d   :  { %v97_v26 = vpop.permute.xlu1 %96 }
  0x8e   :  { %v100_v27 = vsel %vm98_vm5, %v95_v25, %v97_v26 }
  0x8f   :  { %197 = vmatprep.subr.bf16.mxu0 %v100_v27  ;;  %269 = vmatprep.subr.bf16.mxu1 %v100_v27 }
  0x90   :  { %v93_v28 = vpop.permute.xlu0 %92 }
  0x91   :  { %v108_v29 = vpop.permute.xlu1 %107  ;;  %v99_v30 = vsel %vm98_vm5, %v93_v28, %v95_v25 }
  0x92   :  { %198 = vmatpush1.bf16.msra.mxu0 %v99_v30  ;;  %278 = vmatpush1.bf16.msra.mxu1 %v99_v30 }
  0x94   :  { %v110_v31 = vpop.permute.xlu0 %109 }
  0x95   :  { %v106_v32 = vpop.permute.xlu1 %105  ;;  %v113_v33 = vsel %vm111_vm6, %v108_v29, %v110_v31 }
  0x96   :  { %199 = vmatprep.subr.bf16.mxu0 %v113_v33  ;;  %270 = vmatprep.subr.bf16.mxu1 %v113_v33  ;;  %v112_v34 = vsel %vm111_vm6, %v106_v32, %v108_v29 }
  0x97   :  { %200 = vmatpush1.bf16.msra.mxu0 %v112_v34  ;;  %279 = vmatpush1.bf16.msra.mxu1 %v112_v34 }
  0x98   :  { %v121_v35 = vpop.permute.xlu0 %120 }
  0x99   :  { %v123_v36 = vpop.permute.xlu1 %122 }
  0x9a   :  { %v126_v37 = vsel %vm124_vm7, %v121_v35, %v123_v36 }
  0x9b   :  { %201 = vmatprep.subr.bf16.mxu0 %v126_v37  ;;  %271 = vmatprep.subr.bf16.mxu1 %v126_v37 }
  0x9c   :  { %v119_v38 = vpop.permute.xlu0 %118 }
  0x9d   :  { %v134_v39 = vpop.permute.xlu1 %133  ;;  %v125_v40 = vsel %vm124_vm7, %v119_v38, %v121_v35 }
  0x9e   :  { %202 = vmatpush1.bf16.msra.mxu0 %v125_v40  ;;  %280 = vmatpush1.bf16.msra.mxu1 %v125_v40 }
  0xa0   :  { %v136_v41 = vpop.permute.xlu0 %135 }
  0xa1   :  { %v132_v42 = vpop.permute.xlu1 %131  ;;  %v139_v43 = vsel %vm137_vm8, %v134_v39, %v136_v41 }
  0xa2   :  { %203 = vmatprep.subr.bf16.mxu0 %v139_v43  ;;  %272 = vmatprep.subr.bf16.mxu1 %v139_v43  ;;  %v138_v44 = vsel %vm137_vm8, %v132_v42, %v134_v39 }
  0xa3   :  { %204 = vmatpush1.bf16.msra.mxu0 %v138_v44  ;;  %281 = vmatpush1.bf16.msra.mxu1 %v138_v44 }
  0xa6   :  { %220 = vmatmul.mubr.bf16.vlgmr.msra.gmra.mrb[0].mxu0 %v294_v45  ;;  %230 = vmatmul.mubr.bf16.vlgmr.msra.gmra.mrb[0].mxu1 %v297_v46 }
 0x179   :  { %v221_v47 = vpop.f32.mrb[0].mxu0  ;;  %v231_v48 = vpop.f32.mrb[0].mxu1 }
 0x17a   :  { %243 = vst [vmem:[%s370_s2] sm:$0xff] %v221_v47  ;;  %247 = vst [vmem:[%s370_s2 + $0x20] sm:$0xff] %v231_v48  ;;  %v223_v49 = vpop.f32.mrb[1].mxu0  ;;  %v233_v50 = vpop.f32.mrb[1].mxu1 }
 0x17b   :  { %244 = vst [vmem:[%s370_s2 + $0x8] sm:$0xff] %v223_v49  ;;  %248 = vst [vmem:[%s370_s2 + $0x28] sm:$0xff] %v233_v50  ;;  %v225_v51 = vpop.f32.mrb[2].mxu0  ;;  %v235_v52 = vpop.f32.mrb[2].mxu1 }
 0x17c   :  { %245 = vst [vmem:[%s370_s2 + $0x10] sm:$0xff] %v225_v51  ;;  %249 = vst [vmem:[%s370_s2 + $0x30] sm:$0xff] %v235_v52  ;;  %v227_v53 = vpop.f32.mrb[3].mxu0  ;;  %v237_v54 = vpop.f32.mrb[3].mxu1 }
 0x17d   :  { %246 = vst [vmem:[%s370_s2 + $0x18] sm:$0xff] %v227_v53  ;;  %250 = vst [vmem:[%s370_s2 + $0x38] sm:$0xff] %v237_v54 }

</bundles_post_ra>
